<compile_context>
chip_gen: v7x
topology: tpu7x:2x2x1
jax: 0.10.0
libtpu: 0.0.40
codegen_flags: <defaults>
</compile_context>

<pallas_src>
import functools

import jax
import jax.numpy as jnp
import numpy as np
from jax import lax
from jax.experimental import pallas as pl
from jax.experimental.pallas import tpu as pltpu

C_IN = 64      # Conv2d in_channels (fixed by the module)
REPEAT = 32    # block1.repeat(1, 32, 1, 1)
K = 3
TAPS = K * K
TAPS_PAD = 16  # pad 9 taps -> 16 rows (sublane-aligned matmul / weight tiles)
EPS = 1e-5     # BatchNorm2d default eps


def _conv_kernel(x_ref, w_ref, m_ref, z_ref, stats_ref, *, H, W):
    """Per-batch 3x3x64->1 conv (SAME padding) + partial BN stats.

    x_ref:     (1, 64, HW)      input block (one batch element), spatial on lanes
    w_ref:     (TAPS_PAD, 64)   tap-major conv weights (rows >= 9 are zero)
    m_ref:     (TAPS_PAD, HW)   per-tap validity masks (flattened H*W)
    z_ref:     (1, 1, HW)       pre-BN conv output
    stats_ref: (1, 8, 128)      row 0 = sum(z), row 1 = sum(z*z)
    """
    HW = H * W
    x = x_ref[0]            # (64, HW)
    w = w_ref[...]          # (TAPS_PAD, 64)
    m = m_ref[...]          # (TAPS_PAD, HW)

    # Single lane-dense MXU matmul: one push/drain instead of 9 narrow dots.
    y = jnp.dot(w, x, preferred_element_type=jnp.float32,
                precision=lax.Precision.HIGHEST)        # (TAPS_PAD, HW)

    # Combine the 9 taps: shift the small per-tap results (XLU roll) and mask
    # out positions whose source pixel falls in the zero padding.
    z = jnp.zeros((1, HW), jnp.float32)
    for kh in range(K):
        for kw in range(K):
            t = kh * K + kw
            s = (kh - 1) * W + (kw - 1)          # flat offset of tap (dh, dw)
            row = y[t:t + 1, :]                  # (1, HW)
            if s != 0:
                row = pltpu.roll(row, shift=(-s) % HW, axis=1)
            z = z + m[t:t + 1, :] * row
    z_ref[...] = z.reshape(1, 1, HW)

    # Partial BatchNorm statistics for this batch element (reduced in wrapper).
    ssum = jnp.sum(z)
    ssq = jnp.sum(z * z)
    sub = lax.broadcasted_iota(jnp.int32, (1, 8, 128), 1)
    stats_ref[...] = jnp.where(sub == 0, ssum, jnp.where(sub == 1, ssq, 0.0))


def _bn_sigmoid_kernel(bn_ref, z_ref, o_ref):
    """Streamed normalize + sigmoid. bn_ref (SMEM): [scale, shift]."""
    scale = bn_ref[0]
    shift = bn_ref[1]
    o_ref[...] = jax.nn.sigmoid(z_ref[...] * scale + shift)


def _attention_module(x_nchw, w_conv, gamma, beta):
    """x_nchw: (N, 64, H, W); w_conv: (1, 64, 3, 3) OIHW. Returns (N, 32, H, W)."""
    N, C, H, W = x_nchw.shape
    assert C == C_IN
    HW = H * W

    # Free reshape (trailing-dim merge): NCHW with spatial flattened to lanes.
    x_flat = x_nchw.reshape(N, C, HW)

    # OIHW (1, C, 3, 3) -> tap-major (9, C), padded to TAPS_PAD rows.
    w9 = jnp.transpose(w_conv[0], (1, 2, 0)).reshape(TAPS, C)
    w9 = jnp.pad(w9, ((0, TAPS_PAD - TAPS), (0, 0))).astype(jnp.float32)

    # Per-tap validity masks in flat (H*W) space (trace-time constants).
    hh, ww = np.meshgrid(np.arange(H), np.arange(W), indexing="ij")
    masks_np = np.zeros((TAPS_PAD, HW), np.float32)
    for kh in range(K):
        for kw in range(K):
            dh, dw = kh - 1, kw - 1
            valid = ((hh + dh >= 0) & (hh + dh < H) &
                     (ww + dw >= 0) & (ww + dw < W))
            masks_np[kh * K + kw] = valid.reshape(-1).astype(np.float32)
    masks = jnp.asarray(masks_np)

    # ---- Kernel 1: conv + per-batch partial BN stats (parallel over N) ----
    z, stats = pl.pallas_call(
        functools.partial(_conv_kernel, H=H, W=W),
        out_shape=(jax.ShapeDtypeStruct((N, 1, HW), jnp.float32),
                   jax.ShapeDtypeStruct((N, 8, 128), jnp.float32)),
        grid=(N,),
        in_specs=[
            pl.BlockSpec((1, C, HW), lambda n: (n, 0, 0)),        # x (per batch)
            pl.BlockSpec((TAPS_PAD, C), lambda n: (0, 0)),        # weights
            pl.BlockSpec((TAPS_PAD, HW), lambda n: (0, 0)),       # tap masks
        ],
        out_specs=(
            pl.BlockSpec((1, 1, HW), lambda n: (n, 0, 0)),        # conv output
            pl.BlockSpec((1, 8, 128), lambda n: (n, 0, 0)),       # partial stats
        ),
        compiler_params=pltpu.CompilerParams(
            dimension_semantics=("parallel",)),
    )(x_flat, w9, masks)

    # ---- Tiny scalar reduction over N partials: training-mode BN params ----
    count = N * HW
    total = jnp.sum(stats[:, 0, 0])
    total_sq = jnp.sum(stats[:, 1, 0])
    mean = total / count
    var = jnp.maximum(total_sq / count - mean * mean, 0.0)   # biased variance
    scale = gamma * lax.rsqrt(var + EPS)
    shift = beta - mean * scale
    bn = jnp.stack([scale, shift]).astype(jnp.float32)

    # ---- Kernel 2: normalize + sigmoid, streamed lane-dense (parallel over N) ----
    norm = pl.pallas_call(
        _bn_sigmoid_kernel,
        out_shape=jax.ShapeDtypeStruct((N, 1, HW), jnp.float32),
        grid=(N,),
        in_specs=[
            pl.BlockSpec(memory_space=pltpu.MemorySpace.SMEM),    # [scale, shift]
            pl.BlockSpec((1, 1, HW), lambda n: (n, 0, 0)),
        ],
        out_specs=pl.BlockSpec((1, 1, HW), lambda n: (n, 0, 0)),
        compiler_params=pltpu.CompilerParams(
            dimension_semantics=("parallel",)),
    )(bn, z)

    # 32x channel repeat outside the kernel (identical data per channel).
    return jnp.broadcast_to(norm.reshape(N, 1, H, W), (N, REPEAT, H, W))


attention_module = jax.jit(_attention_module)


def _reference(x_nchw, w_conv, gamma, beta):
    z = lax.conv_general_dilated(
        x_nchw, w_conv, window_strides=(1, 1), padding="SAME",
        dimension_numbers=("NCHW", "OIHW", "NCHW"))
    mean = jnp.mean(z)
    var = jnp.mean((z - mean) ** 2)
    y = jax.nn.sigmoid((z - mean) * gamma / jnp.sqrt(var + EPS) + beta)
    return jnp.tile(y, (1, REPEAT, 1, 1))


if __name__ == "__main__":
    key = jax.random.PRNGKey(0)
    kx, kw = jax.random.split(key)

    N, H, W = 2, 16, 16
    x = jax.random.normal(kx, (N, C_IN, H, W), dtype=jnp.float32)

    # Conv2d(64, 1, 3, bias=False) weight: (1, 64, 3, 3), kaiming-uniform-like scale.
    fan_in = C_IN * K * K
    bound = 1.0 / float(np.sqrt(fan_in))
    w_conv = jax.random.uniform(kw, (1, C_IN, K, K), jnp.float32, -bound, bound)

    gamma, beta = 1.0, 0.0   # BatchNorm2d(1) default affine init

    out = attention_module(x, w_conv, gamma, beta)
    out = jax.block_until_ready(out)
    assert out.shape == (N, REPEAT, H, W)

    ref = _reference(x, w_conv, gamma, beta)
    np.testing.assert_allclose(np.asarray(out), np.asarray(ref), rtol=1e-4, atol=1e-5)

    print("KERNEL_OK")
</pallas_src>

<mosaic_0001>
module attributes {stable_mosaic.version = 11 : i64} {
  func.func @_bn_sigmoid_kernel(%arg0: i32, %arg1: memref<2xf32, #tpu.memory_space<smem>>, %arg2: memref<1x1x256xf32, #tpu.memory_space<vmem>>, %arg3: memref<1x1x256xf32, #tpu.memory_space<vmem>>) attributes {dimension_semantics = [#tpu.dimension_semantics<parallel>], iteration_bounds = array<i64: 2>, scalar_prefetch = 0 : i64, scratch_operands = 0 : i64, tpu.core_type = #tpu.core_type<tc>, window_params = [{transform_indices = @transform_0, window_bounds = array<i64: 2>}, {transform_indices = @transform_1, window_bounds = array<i64: 1, 1, 256>}, {transform_indices = @transform_2, window_bounds = array<i64: 1, 1, 256>}]} {
    %c0 = arith.constant 0 : index
    %0 = memref.load %arg1[%c0] : memref<2xf32, #tpu.memory_space<smem>>
    %c1 = arith.constant 1 : index
    %1 = memref.load %arg1[%c1] : memref<2xf32, #tpu.memory_space<smem>>
    %c0_0 = arith.constant 0 : index
    %c0_1 = arith.constant 0 : index
    %c0_2 = arith.constant 0 : index
    %2 = vector.load %arg2[%c0_0, %c0_1, %c0_2] : memref<1x1x256xf32, #tpu.memory_space<vmem>>, vector<1x1x256xf32>
    %3 = vector.broadcast %0 : f32 to vector<1x1x256xf32>
    %4 = arith.mulf %2, %3 : vector<1x1x256xf32>
    %5 = vector.broadcast %1 : f32 to vector<1x1x256xf32>
    %6 = arith.addf %4, %5 : vector<1x1x256xf32>
    %7 = arith.negf %6 : vector<1x1x256xf32>
    %8 = math.exp %7 : vector<1x1x256xf32>
    %cst = arith.constant 1.000000e+00 : f32
    %9 = vector.broadcast %cst : f32 to vector<1x1x256xf32>
    %10 = arith.addf %9, %8 : vector<1x1x256xf32>
    %11 = arith.divf %9, %10 : vector<1x1x256xf32>
    %c0_3 = arith.constant 0 : index
    %c0_4 = arith.constant 0 : index
    %c0_5 = arith.constant 0 : index
    %12 = vector.load %arg3[%c0_3, %c0_4, %c0_5] : memref<1x1x256xf32, #tpu.memory_space<vmem>>, vector<1x1x256xf32>
    tpu.vector_store %arg3[%c0_3, %c0_4, %c0_5], %11 {strides = array<i32>} : memref<1x1x256xf32, #tpu.memory_space<vmem>>, vector<1x1x256xf32>,
    return
  }
  func.func @transform_0(%arg0: i32) -> i32 {
    %c0_i32 = arith.constant 0 : i32
    %c0_i32_0 = arith.constant 0 : i32
    return %c0_i32 : i32
  }
  func.func @transform_1(%arg0: i32) -> (i32, i32, i32) {
    %c0_i32 = arith.constant 0 : i32
    %c0_i32_0 = arith.constant 0 : i32
    %c0_i32_1 = arith.constant 0 : i32
    return %arg0, %c0_i32, %c0_i32_0 : i32, i32, i32
  }
  func.func @transform_2(%arg0: i32) -> (i32, i32, i32) {
    %c0_i32 = arith.constant 0 : i32
    %c0_i32_0 = arith.constant 0 : i32
    %c0_i32_1 = arith.constant 0 : i32
    return %arg0, %c0_i32, %c0_i32_0 : i32, i32, i32
  }
}

module attributes {stable_mosaic.version = 11 : i64} {
  func.func @_conv_kernel(%arg0: i32, %arg1: memref<1x64x256xf32, #tpu.memory_space<vmem>>, %arg2: memref<16x64xf32, #tpu.memory_space<vmem>>, %arg3: memref<16x256xf32, #tpu.memory_space<vmem>>, %arg4: memref<1x1x256xf32, #tpu.memory_space<vmem>>, %arg5: memref<1x8x128xf32, #tpu.memory_space<vmem>>) attributes {dimension_semantics = [#tpu.dimension_semantics<parallel>], iteration_bounds = array<i64: 2>, scalar_prefetch = 0 : i64, scratch_operands = 0 : i64, tpu.core_type = #tpu.core_type<tc>, window_params = [{transform_indices = @transform_0, window_bounds = array<i64: 1, 64, 256>}, {pipeline_mode = #tpu.pipeline_mode<synchronous>, transform_indices = @transform_1, window_bounds = array<i64: 16, 64>}, {pipeline_mode = #tpu.pipeline_mode<synchronous>, transform_indices = @transform_2, window_bounds = array<i64: 16, 256>}, {transform_indices = @transform_3, window_bounds = array<i64: 1, 1, 256>}, {transform_indices = @transform_4, window_bounds = array<i64: 1, 8, 128>}]} {
    %c0 = arith.constant 0 : index
    %c0_0 = arith.constant 0 : index
    %c0_1 = arith.constant 0 : index
    %0 = vector.load %arg1[%c0, %c0_0, %c0_1] : memref<1x64x256xf32, #tpu.memory_space<vmem>>, vector<1x64x256xf32>
    %1 = vector.shape_cast %0 : vector<1x64x256xf32> to vector<64x256xf32>
    %c0_2 = arith.constant 0 : index
    %c0_3 = arith.constant 0 : index
    %2 = vector.load %arg2[%c0_2, %c0_3] : memref<16x64xf32, #tpu.memory_space<vmem>>, vector<16x64xf32>
    %c0_4 = arith.constant 0 : index
    %c0_5 = arith.constant 0 : index
    %3 = vector.load %arg3[%c0_4, %c0_5] : memref<16x256xf32, #tpu.memory_space<vmem>>, vector<16x256xf32>
    %cst = arith.constant dense<0.000000e+00> : vector<16x256xf32>
    %4 = tpu.matmul %2, %1, %cst {dimension_numbers = #tpu.dot_dimension_numbers<[1], [0], [0], [1], [0, 0, 1, 1], [], []>, precision = #tpu.contract_precision<fp32>} : vector<16x64xf32>, vector<64x256xf32>, vector<16x256xf32> -> vector<16x256xf32>
    %cst_6 = arith.constant 0.000000e+00 : f32
    %5 = vector.broadcast %cst_6 : f32 to vector<1x256xf32>
    %6 = vector.extract_strided_slice %4 {offsets = [0, 0], sizes = [1, 256], strides = [1, 1]} : vector<16x256xf32> to vector<1x256xf32>
    %c17_i32 = arith.constant 17 : i32
    %7 = tpu.dynamic_rotate %6 by %c17_i32 dim 1 : vector<1x256xf32>, i32 -> vector<1x256xf32>
    %8 = vector.extract_strided_slice %3 {offsets = [0, 0], sizes = [1, 256], strides = [1, 1]} : vector<16x256xf32> to vector<1x256xf32>
    %9 = arith.mulf %8, %7 : vector<1x256xf32>
    %10 = arith.addf %5, %9 : vector<1x256xf32>
    %11 = vector.extract_strided_slice %4 {offsets = [1, 0], sizes = [1, 256], strides = [1, 1]} : vector<16x256xf32> to vector<1x256xf32>
    %c16_i32 = arith.constant 16 : i32
    %12 = tpu.dynamic_rotate %11 by %c16_i32 dim 1 : vector<1x256xf32>, i32 -> vector<1x256xf32>
    %13 = vector.extract_strided_slice %3 {offsets = [1, 0], sizes = [1, 256], strides = [1, 1]} : vector<16x256xf32> to vector<1x256xf32>
    %14 = arith.mulf %13, %12 : vector<1x256xf32>
    %15 = arith.addf %10, %14 : vector<1x256xf32>
    %16 = vector.extract_strided_slice %4 {offsets = [2, 0], sizes = [1, 256], strides = [1, 1]} : vector<16x256xf32> to vector<1x256xf32>
    %c15_i32 = arith.constant 15 : i32
    %17 = tpu.dynamic_rotate %16 by %c15_i32 dim 1 : vector<1x256xf32>, i32 -> vector<1x256xf32>
    %18 = vector.extract_strided_slice %3 {offsets = [2, 0], sizes = [1, 256], strides = [1, 1]} : vector<16x256xf32> to vector<1x256xf32>
    %19 = arith.mulf %18, %17 : vector<1x256xf32>
    %20 = arith.addf %15, %19 : vector<1x256xf32>
    %21 = vector.extract_strided_slice %4 {offsets = [3, 0], sizes = [1, 256], strides = [1, 1]} : vector<16x256xf32> to vector<1x256xf32>
    %c1_i32 = arith.constant 1 : i32
    %22 = tpu.dynamic_rotate %21 by %c1_i32 dim 1 : vector<1x256xf32>, i32 -> vector<1x256xf32>
    %23 = vector.extract_strided_slice %3 {offsets = [3, 0], sizes = [1, 256], strides = [1, 1]} : vector<16x256xf32> to vector<1x256xf32>
    %24 = arith.mulf %23, %22 : vector<1x256xf32>
    %25 = arith.addf %20, %24 : vector<1x256xf32>
    %26 = vector.extract_strided_slice %4 {offsets = [4, 0], sizes = [1, 256], strides = [1, 1]} : vector<16x256xf32> to vector<1x256xf32>
    %27 = vector.extract_strided_slice %3 {offsets = [4, 0], sizes = [1, 256], strides = [1, 1]} : vector<16x256xf32> to vector<1x256xf32>
    %28 = arith.mulf %27, %26 : vector<1x256xf32>
    %29 = arith.addf %25, %28 : vector<1x256xf32>
    %30 = vector.extract_strided_slice %4 {offsets = [5, 0], sizes = [1, 256], strides = [1, 1]} : vector<16x256xf32> to vector<1x256xf32>
    %c255_i32 = arith.constant 255 : i32
    %31 = tpu.dynamic_rotate %30 by %c255_i32 dim 1 : vector<1x256xf32>, i32 -> vector<1x256xf32>
    %32 = vector.extract_strided_slice %3 {offsets = [5, 0], sizes = [1, 256], strides = [1, 1]} : vector<16x256xf32> to vector<1x256xf32>
    %33 = arith.mulf %32, %31 : vector<1x256xf32>
    %34 = arith.addf %29, %33 : vector<1x256xf32>
    %35 = vector.extract_strided_slice %4 {offsets = [6, 0], sizes = [1, 256], strides = [1, 1]} : vector<16x256xf32> to vector<1x256xf32>
    %c241_i32 = arith.constant 241 : i32
    %36 = tpu.dynamic_rotate %35 by %c241_i32 dim 1 : vector<1x256xf32>, i32 -> vector<1x256xf32>
    %37 = vector.extract_strided_slice %3 {offsets = [6, 0], sizes = [1, 256], strides = [1, 1]} : vector<16x256xf32> to vector<1x256xf32>
    %38 = arith.mulf %37, %36 : vector<1x256xf32>
    %39 = arith.addf %34, %38 : vector<1x256xf32>
    %40 = vector.extract_strided_slice %4 {offsets = [7, 0], sizes = [1, 256], strides = [1, 1]} : vector<16x256xf32> to vector<1x256xf32>
    %c240_i32 = arith.constant 240 : i32
    %41 = tpu.dynamic_rotate %40 by %c240_i32 dim 1 : vector<1x256xf32>, i32 -> vector<1x256xf32>
    %42 = vector.extract_strided_slice %3 {offsets = [7, 0], sizes = [1, 256], strides = [1, 1]} : vector<16x256xf32> to vector<1x256xf32>
    %43 = arith.mulf %42, %41 : vector<1x256xf32>
    %44 = arith.addf %39, %43 : vector<1x256xf32>
    %45 = vector.extract_strided_slice %4 {offsets = [8, 0], sizes = [1, 256], strides = [1, 1]} : vector<16x256xf32> to vector<1x256xf32>
    %c239_i32 = arith.constant 239 : i32
    %46 = tpu.dynamic_rotate %45 by %c239_i32 dim 1 : vector<1x256xf32>, i32 -> vector<1x256xf32>
    %47 = vector.extract_strided_slice %3 {offsets = [8, 0], sizes = [1, 256], strides = [1, 1]} : vector<16x256xf32> to vector<1x256xf32>
    %48 = arith.mulf %47, %46 : vector<1x256xf32>
    %49 = arith.addf %44, %48 : vector<1x256xf32>
    %50 = vector.shape_cast %49 : vector<1x256xf32> to vector<1x1x256xf32>
    %c0_7 = arith.constant 0 : index
    %c0_8 = arith.constant 0 : index
    %c0_9 = arith.constant 0 : index
    %51 = vector.load %arg4[%c0_7, %c0_8, %c0_9] : memref<1x1x256xf32, #tpu.memory_space<vmem>>, vector<1x1x256xf32>
    tpu.vector_store %arg4[%c0_7, %c0_8, %c0_9], %50 {strides = array<i32>} : memref<1x1x256xf32, #tpu.memory_space<vmem>>, vector<1x1x256xf32>,
    %52 = vector.shape_cast %49 : vector<1x256xf32> to vector<1x1x256xf32>
    %cst_10 = arith.constant dense<0.000000e+00> : vector<1xf32>
    %53 = vector.multi_reduction <add>, %52, %cst_10 [1, 2] : vector<1x1x256xf32> to vector<1xf32>
    %54 = vector.shape_cast %53 : vector<1xf32> to vector<1x1x1xf32>
    %55 = vector.extract %54[0, 0, 0] : f32 from vector<1x1x1xf32>
    %56 = arith.mulf %49, %49 : vector<1x256xf32>
    %57 = vector.shape_cast %56 : vector<1x256xf32> to vector<1x1x256xf32>
    %cst_11 = arith.constant dense<0.000000e+00> : vector<1xf32>
    %58 = vector.multi_reduction <add>, %57, %cst_11 [1, 2] : vector<1x1x256xf32> to vector<1xf32>
    %59 = vector.shape_cast %58 : vector<1xf32> to vector<1x1x1xf32>
    %60 = vector.extract %59[0, 0, 0] : f32 from vector<1x1x1xf32>
    %61 = tpu.iota {dimensions = array<i32: 1>} : vector<1x8x128xi32>
    %c0_i32 = arith.constant 0 : i32
    %62 = vector.broadcast %c0_i32 : i32 to vector<1x8x128xi32>
    %63 = arith.cmpi eq, %61, %62 : vector<1x8x128xi32>
    %c1_i32_12 = arith.constant 1 : i32
    %64 = vector.broadcast %c1_i32_12 : i32 to vector<1x8x128xi32>
    %65 = arith.cmpi eq, %61, %64 : vector<1x8x128xi32>
    %cst_13 = arith.constant 0.000000e+00 : f32
    %66 = vector.broadcast %60 : f32 to vector<1x8x128xf32>
    %67 = vector.broadcast %cst_13 : f32 to vector<1x8x128xf32>
    %68 = arith.select %65, %66, %67 : vector<1x8x128xi1>, vector<1x8x128xf32>
    %69 = vector.broadcast %55 : f32 to vector<1x8x128xf32>
    %70 = arith.select %63, %69, %68 : vector<1x8x128xi1>, vector<1x8x128xf32>
    %c0_14 = arith.constant 0 : index
    %c0_15 = arith.constant 0 : index
    %c0_16 = arith.constant 0 : index
    %71 = vector.load %arg5[%c0_14, %c0_15, %c0_16] : memref<1x8x128xf32, #tpu.memory_space<vmem>>, vector<1x8x128xf32>
    tpu.vector_store %arg5[%c0_14, %c0_15, %c0_16], %70 {strides = array<i32>} : memref<1x8x128xf32, #tpu.memory_space<vmem>>, vector<1x8x128xf32>,
    return
  }
  func.func @transform_0(%arg0: i32) -> (i32, i32, i32) {
    %c0_i32 = arith.constant 0 : i32
    %c0_i32_0 = arith.constant 0 : i32
    %c0_i32_1 = arith.constant 0 : i32
    return %arg0, %c0_i32, %c0_i32_0 : i32, i32, i32
  }
  func.func @transform_1(%arg0: i32) -> (i32, i32) {
    %c0_i32 = arith.constant 0 : i32
    %c0_i32_0 = arith.constant 0 : i32
    %c0_i32_1 = arith.constant 0 : i32
    return %c0_i32, %c0_i32_0 : i32, i32
  }
  func.func @transform_2(%arg0: i32) -> (i32, i32) {
    %c0_i32 = arith.constant 0 : i32
    %c0_i32_0 = arith.constant 0 : i32
    %c0_i32_1 = arith.constant 0 : i32
    return %c0_i32, %c0_i32_0 : i32, i32
  }
  func.func @transform_3(%arg0: i32) -> (i32, i32, i32) {
    %c0_i32 = arith.constant 0 : i32
    %c0_i32_0 = arith.constant 0 : i32
    %c0_i32_1 = arith.constant 0 : i32
    return %arg0, %c0_i32, %c0_i32_0 : i32, i32, i32
  }
  func.func @transform_4(%arg0: i32) -> (i32, i32, i32) {
    %c0_i32 = arith.constant 0 : i32
    %c0_i32_0 = arith.constant 0 : i32
    %c0_i32_1 = arith.constant 0 : i32
    return %arg0, %c0_i32, %c0_i32_0 : i32, i32, i32
  }
}

</mosaic_0001>

<bundles_post_ra>
// kernel: _attention_module.3
= control target key start
LH: loop header
LB: loop body
LE: loop exit
PB: predicated region body
PF: predicated region fallthrough
CT: control target
= control target key end

     0   :  { %7 = vsyncpa [#allocation3], 0  ;;  %s315_s9 = smov 0   ;;  %s346_s0 = inlined_call_operand.vmem [shape: f32[2], index: 0, kind: input, shape index: {}]   ;;  %s347_s1 = inlined_call_operand.vmem [shape: f32[2,1,256], index: 1, kind: input, shape index: {}]   ;;  %s348_s2 = inlined_call_operand.vmem [shape: f32[2,1,256], index: 2, kind: output, shape index: {}]  }
   0x1 LB: > { %s236_s10 = sadd.s32 4294967295, %s297_s9   ;;  %p238_p0 = scmp.ge.s32.totalorder %s297_s9, 1  ;;  %s297_s9 = sphi %s315_s9, %s13_s9  }
   0x2   : > { %p91_p1 = scmp.lt.s32.totalorder %s297_s9, 3  ;;  %s104_s13 = sshll.u32 %s346_s0, 4  ;;  %s105_s13 = int_to_ptr.vmem [resolvable:$true] %s104_s13 }
   0x3   : > { %p257_p3 = scmp.eq.s32.totalorder %s236_s10, 0  ;;  %s272_s15 = scalar_lea.vmem %s105_s13, 16 }
   0x4   : > { %p326_p2 = pnand %p238_p0, %p91_p1  ;;  %p273_p6 = scmp.ne.s32.totalorder %s105_s13, %s272_s15 }
   0x5   : > { %p280_p10 = scmp.lt.s32.totalorder %s105_s13, %s105_s13  ;;  %p281_p11 = scmp.lt.s32.totalorder %s272_s15, %s272_s15 }
   0x6   : > { %p253_p4 = pneg %p326_p2 }
   0x7   : > { %p282_p12 = por %p281_p11, %p280_p10 }
   0x8   : > { %p254_p5 = pnand %p257_p3, %p253_p4 }
   0xa   : > { %p274_p7 = pneg %p254_p5 }
   0xc   : > { %p275_p8 = pnand %p274_p7, %p273_p6 }
   0xe   : > { %p276_p9 = pneg %p275_p8 }
  0x10   : > { %p283_p13 = pnand %p282_p12, %p276_p9 }
  0x12   : > { %286 = shalt.err (!%p283_p13)
}
  0x13   : > { %s299_s16 = smov [#allocation2]   ;;  %124 = sbr.rel (%p326_p2) target bundleno = 67 (0x43), region = 28 }
  0x14   : > { %256 = dma.vmem_to_smem (!%p254_p5), %s105_s13, 16, %s299_s16, [#allocation3]  }
  0x1a   : > { %292 = dma.done.wait (%p257_p3), [#allocation3], 16  }
  0x1b   : > { %294 = vsyncadd (%p257_p3), [#allocation3], 4294967280 }
  0x1c   : > { %130 = sfence }
  0x1d   : > { %p145_p0 = scmp.lt.s32.totalorder %s236_s10, 1  ;;  %s153_s17 = sld [smem:[#allocation2]]  ;;  %v166_v8 = vlaneseq }
  0x1e   : > { %s245_s18 = sld [smem:[#allocation2 + $0x1]] }
  0x1f   : > { %s351_s10 = smov (!%p145_p0, %s236_s10), 1  ;;  %vm168_vm0 = vcmp.lt.s32.totalorder %v166_v8, 256 }
  0x20   : > { %s243_s19 = sshll.u32 %s351_s10, 1 }
  0x21   : > { %s148_s22 = scalar_lea.vmem %s347_s1, %s243_s19  ;;  %s152_s25 = scalar_lea.vmem %s348_s2, %s243_s19 }
  0x22   : > { %v155_v0 = vld [vmem:[%s148_s22] sm:$0x3] }
  0x23   : > { %v156_v1 = vstv %s153_s17 }
  0x24   : > { %v157_v2 = vmul.f32 %v156_v1, %v155_v0  ;;  %v158_v3 = vstv %s245_s18 }
  0x26   : > { %v159_v4 = vadd.f32 %v158_v3, %v157_v2 }
  0x28   : > { %v246_v5 = vmul.f32 -1.442695, %v159_v4 }
  0x2a   : > { %268 = vpow2.f32 %v246_v5 }
  0x34   : > { %v269_v6 = vpop.eup %268 }
  0x35   : > { %v163_v7 = vadd.f32 1.0, %v269_v6 }
  0x37   : > { %270 = vrcp.f32 %v163_v7 }
  0x41   : > { %v271_v9 = vpop.eup %270 }
  0x42   : > { %170 = vst.msk [vmem:[%s152_s25] sm:$0x3] %vm168_vm0, %v271_v9 }
  0x43 PF: > { %s13_s9 = sadd.s32 1, %s297_s9  }
  0x44   : > { %p10_p1 = scmp.ge.s32.totalorder %s13_s9, 4  }
  0x46   :  { %12 = sbr.rel (!%p10_p1) target bundleno = 1 (0x1), region = 63 }
  0x4d   :  { %190 = vsyncpa [#allocation3], 1 }
  0x4e   :  { %192 = vsyncpa [#allocation3 + $0x1], 1 }

// kernel: _attention_module.2
= control target key start
LH: loop header
LB: loop body
LE: loop exit
PB: predicated region body
PF: predicated region fallthrough
CT: control target
= control target key end

     0   :  { %s1466_s15 = smov 0   ;;  %s1742_s0 = inlined_call_operand.vmem [shape: f32[2,64,256], index: 0, kind: input, shape index: {}]   ;;  %s1743_s1 = inlined_call_operand.vmem [shape: f32[16,64], index: 1, kind: input, shape index: {}]   ;;  %s1744_s2 = inlined_call_operand.vmem [shape: f32[16,256], index: 2, kind: input, shape index: {}]   ;;  %s1745_s3 = inlined_call_operand.vmem [shape: f32[2,1,256], index: 3, kind: output, shape index: {0}]   ;;  %s1746_s4 = inlined_call_operand.vmem [shape: f32[2,8,128], index: 4, kind: output, shape index: {1}]  }
   0x1 LB: > { %s1273_s16 = sadd.s32 4294967295, %s1429_s15   ;;  %p1277_p0 = scmp.ge.s32.totalorder %s1429_s15, 1  ;;  %s1429_s15 = sphi %s1466_s15, %s15_s15  }
   0x2   : > { %p165_p1 = scmp.lt.s32.totalorder %s1429_s15, 3 }
   0x4   : > { %p166_p2 = pnand %p1277_p0, %p165_p1 }
   0x5   : > { %p194_p3 = scmp.lt.s32.totalorder (!%p166_p2), %s1273_s16, 1  ;;  %v223_v0 = vld [vmem:[%s1743_s1] sm:$0xff] (!%p166_p2)  ;;  %vm229_vm0 = vcmask (!%p166_p2), 523264   ;;  %v224_v1 = vld [vmem:[%s1743_s1 + $0x8] sm:$0xff] (!%p166_p2)  ;;  %v1431_v2 = vmov (!%p166_p2), 0.0   ;;  %s1432_s25 = smov (!%p166_p2), 17  }
   0x6   : > { %169 = sbr.rel (%p166_p2) target bundleno = 648 (0x288), region = 32  ;;  %316 = vmatprep.mubr.f32.mxu1 (!%p166_p2), %v1431_v2  ;;  %691 = vmatprep.mubr.f32.mxu0 (!%p166_p2), %v1431_v2  ;;  %v231_v3 = vsel (!%p166_p2), %vm229_vm0, %v223_v0, 0  ;;  %v234_v4 = vsel (!%p166_p2), %vm229_vm0, %v224_v1, 0  ;;  %s1433_s26 = smov (!%p166_p2), 16   ;;  %vm1153_vm9 = vcmask (!%p166_p2), 1040384  }
   0x7   : > { %v1484_v5 = vand.u32 (!%p166_p2), 4294901760, %v231_v3  ;;  %v1486_v6 = vand.u32 (!%p166_p2), 4294901760, %v234_v4  ;;  %s1434_s27 = smov (!%p166_p2), 15   ;;  %s1435_s28 = smov (!%p166_p2), 1  }
   0x8   : > { %s1436_s29 = smov (!%p166_p2), 127   ;;  %s1437_s30 = smov (!%p166_p2), 113  }
   0x9   : > { %v1490_v7 = vsub.f32 (!%p166_p2), %v231_v3, %v1484_v5  ;;  %v1493_v8 = vsub.f32 (!%p166_p2), %v234_v4, %v1486_v6  ;;  %s1438_s5 = smov (!%p166_p2), 112   ;;  %s1439_s6 = smov (!%p166_p2), 111  }
   0xb   : > { %v319_v12 = vand.u32 (!%p166_p2), 4294901760, %v1490_v7  ;;  %v330_v13 = vand.u32 (!%p166_p2), 4294901760, %v1493_v8 }
   0xd   : > { %s1748_s16 = smov (!%p194_p3, %s1273_s16), 1  ;;  %v1523_v32 = vsub.f32 %v1490_v7, %v319_v12 }
   0xe   : > { %s1284_s21 = sshll.u32 %s1748_s16, 7  ;;  %s1280_s17 = sshll.u32 %s1748_s16, 1 }
   0xf   : > { %s1498_s24 = scalar_lea.vmem %s1742_s0, %s1284_s21  ;;  %s202_s20 = scalar_lea.vmem %s1745_s3, %s1280_s17 }
  0x10   : > { %v208_v9 = vld [vmem:[%s1498_s24 + $0x8] sm:$0xff]  ;;  %v210_v10 = vld [vmem:[%s1498_s24 + $0x18] sm:$0xff]  ;;  %v207_v11 = vld [vmem:[%s1498_s24] sm:$0xff]  ;;  %s1281_s21 = sshll.u32 %s1748_s16, 3 }
  0x11   : > { %v236_v14 = vand.u32 4294901760, %v208_v9  ;;  %v240_v15 = vand.u32 4294901760, %v210_v10  ;;  %v209_v16 = vld [vmem:[%s1498_s24 + $0x10] sm:$0xff]  ;;  %v238_v17 = vand.u32 4294901760, %v207_v11  ;;  %v212_v18 = vld [vmem:[%s1498_s24 + $0x28] sm:$0xff]  ;;  %v214_v19 = vld [vmem:[%s1498_s24 + $0x38] sm:$0xff] }
  0x12   : > { %v242_v20 = vand.u32 4294901760, %v209_v16  ;;  %v244_v21 = vand.u32 4294901760, %v212_v18  ;;  %v248_v22 = vand.u32 4294901760, %v214_v19  ;;  %v211_v23 = vld [vmem:[%s1498_s24 + $0x20] sm:$0xff]  ;;  %v213_v24 = vld [vmem:[%s1498_s24 + $0x30] sm:$0xff]  ;;  %v216_v25 = vld [vmem:[%s1498_s24 + $0x48] sm:$0xff] }
  0x13   : > { %v1511_v26 = vpack.c.bf16 %v240_v15, %v236_v14  ;;  %v1513_v27 = vsub.f32 %v208_v9, %v236_v14  ;;  %v1515_v28 = vsub.f32 %v210_v10, %v240_v15  ;;  %v218_v29 = vld [vmem:[%s1498_s24 + $0x58] sm:$0xff]  ;;  %v215_v30 = vld [vmem:[%s1498_s24 + $0x40] sm:$0xff]  ;;  %v217_v31 = vld [vmem:[%s1498_s24 + $0x50] sm:$0xff]  ;;  %v1527_v34 = vsub.f32 %v207_v11, %v238_v17 }
  0x14   : > { %v1525_v33 = vpack.c.bf16 %v242_v20, %v238_v17  ;;  %v1529_v35 = vsub.f32 %v209_v16, %v242_v20  ;;  %v1531_v36 = vpack.c.bf16 %v248_v22, %v244_v21  ;;  %v220_v37 = vld [vmem:[%s1498_s24 + $0x68] sm:$0xff]  ;;  %v222_v38 = vld [vmem:[%s1498_s24 + $0x78] sm:$0xff]  ;;  %v1537_v39 = vsub.f32 %v212_v18, %v244_v21  ;;  %v219_v51 = vld [vmem:[%s1498_s24 + $0x60] sm:$0xff] }
  0x15   : > { %1286 = vmatprep.subr.bf16.mxu1 %v1511_v26  ;;  %1334 = vmatprep.subr.bf16.mxu0 %v1511_v26  ;;  %v246_v40 = vand.u32 4294901760, %v211_v23  ;;  %v250_v41 = vand.u32 4294901760, %v213_v24  ;;  %v252_v42 = vand.u32 4294901760, %v216_v25  ;;  %v256_v43 = vand.u32 4294901760, %v218_v29  ;;  %v221_v52 = vld [vmem:[%s1498_s24 + $0x70] sm:$0xff] }
  0x16   : > { %1288 = vmatpush1.bf16.msra.mxu1 %v1525_v33  ;;  %1336 = vmatpush1.bf16.msra.mxu0 %v1525_v33  ;;  %v254_v44 = vand.u32 4294901760, %v215_v30  ;;  %v258_v45 = vand.u32 4294901760, %v217_v31  ;;  %v260_v46 = vand.u32 4294901760, %v220_v37  ;;  %v1542_v47 = vsub.f32 %v214_v19, %v248_v22 }
  0x17   : > { %1290 = vmatprep.subr.bf16.mxu1 %v1531_v36  ;;  %1338 = vmatprep.subr.bf16.mxu0 %v1531_v36  ;;  %v1545_v48 = vpack.c.bf16 %v250_v41, %v246_v40  ;;  %v1547_v49 = vsub.f32 %v211_v23, %v246_v40  ;;  %v264_v50 = vand.u32 4294901760, %v222_v38  ;;  %v1551_v53 = vsub.f32 %v213_v24, %v250_v41 }
  0x18   : > { %v1553_v54 = vpack.c.bf16 %v256_v43, %v252_v42  ;;  %v1555_v55 = vsub.f32 %v216_v25, %v252_v42  ;;  %v1557_v56 = vsub.f32 %v218_v29, %v256_v43  ;;  %v1559_v57 = vpack.c.bf16 %v258_v45, %v254_v44 }
  0x19   : > { %v1561_v58 = vsub.f32 %v215_v30, %v254_v44  ;;  %v1563_v59 = vsub.f32 %v217_v31, %v258_v45  ;;  %v1565_v60 = vpack.c.bf16 %v264_v50, %v260_v46  ;;  %v1569_v61 = vsub.f32 %v220_v37, %v260_v46 }
  0x1a   : > { %1292 = vmatpush1.bf16.msra.mxu1 %v1545_v48  ;;  %1340 = vmatpush1.bf16.msra.mxu0 %v1545_v48  ;;  %v262_v62 = vand.u32 4294901760, %v219_v51  ;;  %v266_v63 = vand.u32 4294901760, %v221_v52  ;;  %v341_v0 = vand.u32 4294901760, %v1513_v27  ;;  %v1574_v1 = vsub.f32 %v222_v38, %v264_v50 }
  0x1b   : > { %1294 = vmatprep.subr.bf16.mxu1 %v1553_v54  ;;  %1342 = vmatprep.subr.bf16.mxu0 %v1553_v54  ;;  %v353_v3 = vand.u32 4294901760, %v1515_v28  ;;  %v347_v4 = vand.u32 4294901760, %v1527_v34  ;;  %v359_v9 = vand.u32 4294901760, %v1529_v35  ;;  %v321_v15 = vand.u32 4294901760, %v1523_v32 }
  0x1c   : > { %v1579_v10 = vpack.c.bf16 %v266_v63, %v262_v62  ;;  %v1581_v11 = vsub.f32 %v219_v51, %v262_v62  ;;  %v342_v14 = vsub.f32 %v1513_v27, %v341_v0  ;;  %v1585_v16 = vsub.f32 %v221_v52, %v266_v63 }
  0x1d   : > { %v354_v17 = vsub.f32 %v1515_v28, %v353_v3  ;;  %v348_v18 = vsub.f32 %v1527_v34, %v347_v4  ;;  %v360_v19 = vsub.f32 %v1529_v35, %v359_v9  ;;  %v1349_v21 = vpack.c.bf16 %v353_v3, %v341_v0 }
  0x1e   : > { %1296 = vmatpush1.bf16.msra.mxu1 %v1559_v57  ;;  %1344 = vmatpush1.bf16.msra.mxu0 %v1559_v57  ;;  %v343_v20 = vand.u32 4294901760, %v342_v14  ;;  %v365_v22 = vand.u32 4294901760, %v1537_v39  ;;  %v377_v23 = vand.u32 4294901760, %v1542_v47  ;;  %v371_v30 = vand.u32 4294901760, %v1547_v49 }
  0x1f   : > { %1298 = vmatprep.subr.bf16.mxu1 %v1565_v60  ;;  %1346 = vmatprep.subr.bf16.mxu0 %v1565_v60  ;;  %v355_v24 = vand.u32 4294901760, %v354_v17  ;;  %v349_v25 = vand.u32 4294901760, %v348_v18  ;;  %v361_v29 = vand.u32 4294901760, %v360_v19  ;;  %v1351_v31 = vpack.c.bf16 %v359_v9, %v347_v4 }
  0x20   : > { %v366_v32 = vsub.f32 %v1537_v39, %v365_v22  ;;  %v378_v37 = vsub.f32 %v1542_v47, %v377_v23  ;;  %v383_v38 = vand.u32 4294901760, %v1551_v53  ;;  %v1353_v41 = vpack.c.bf16 %v377_v23, %v365_v22 }
  0x21   : > { %v1301_v40 = vpack.c.bf16 %v355_v24, %v343_v20  ;;  %v372_v42 = vsub.f32 %v1547_v49, %v371_v30  ;;  %v389_v43 = vand.u32 4294901760, %v1555_v55  ;;  %v1303_v44 = vpack.c.bf16 %v361_v29, %v349_v25 }
  0x22   : > { %1300 = vmatpush1.bf16.msra.mxu1 %v1579_v10  ;;  %1348 = vmatpush1.bf16.msra.mxu0 %v1579_v10  ;;  %v367_v45 = vand.u32 4294901760, %v366_v32  ;;  %v379_v46 = vand.u32 4294901760, %v378_v37  ;;  %v384_v50 = vsub.f32 %v1551_v53, %v383_v38  ;;  %v401_v62 = vand.u32 4294901760, %v1557_v56 }
  0x23   : > { %1302 = vmatprep.subr.bf16.mxu1 %v1301_v40  ;;  %1350 = vmatprep.subr.bf16.mxu0 %v1349_v21  ;;  %v373_v51 = vand.u32 4294901760, %v372_v42  ;;  %v390_v52 = vsub.f32 %v1555_v55, %v389_v43  ;;  %v395_v63 = vand.u32 4294901760, %v1561_v58  ;;  %v407_v4 = vand.u32 4294901760, %v1563_v59 }
  0x24   : > { %v1305_v0 = vpack.c.bf16 %v379_v46, %v367_v45  ;;  %v385_v3 = vand.u32 4294901760, %v384_v50  ;;  %v413_v9 = vand.u32 4294901760, %v1569_v61  ;;  %v1355_v14 = vpack.c.bf16 %v383_v38, %v371_v30 }
  0x25   : > { %322 = vmatmul.mubr.f32.vlgmr.msra.gmra.mrb[0].mxu1 %v321_v15  ;;  %695 = vmatmul.mubr.f32.vlgmr.msra.gmra.mrb[0].mxu0 %v319_v12  ;;  %v391_v17 = vand.u32 4294901760, %v390_v52  ;;  %v402_v18 = vsub.f32 %v1557_v56, %v401_v62  ;;  %v396_v19 = vsub.f32 %v1561_v58, %v395_v63  ;;  %v1357_v21 = vpack.c.bf16 %v401_v62, %v389_v43 }
  0x26   : > { %1304 = vmatpush1.bf16.msra.mxu1 %v1303_v44  ;;  %1352 = vmatpush1.bf16.msra.mxu0 %v1351_v31  ;;  %v1307_v20 = vpack.c.bf16 %v385_v3, %v373_v51  ;;  %v408_v22 = vsub.f32 %v1563_v59, %v407_v4  ;;  %v425_v23 = vand.u32 4294901760, %v1574_v1  ;;  %v414_v12 = vsub.f32 %v1569_v61, %v413_v9 }
  0x27   : > { %1306 = vmatprep.subr.bf16.mxu1 %v1305_v0  ;;  %1354 = vmatprep.subr.bf16.mxu0 %v1353_v41  ;;  %v403_v15 = vand.u32 4294901760, %v402_v18  ;;  %v397_v24 = vand.u32 4294901760, %v396_v19  ;;  %v331_v25 = vsub.f32 %v1493_v8, %v330_v13  ;;  %v419_v31 = vand.u32 4294901760, %v1581_v11 }
  0x28   : > { %v409_v29 = vand.u32 4294901760, %v408_v22  ;;  %327 = vmatprep.mubr.f32.mxu1 %v1431_v2  ;;  %v426_v30 = vsub.f32 %v1574_v1, %v425_v23  ;;  %700 = vmatprep.mubr.f32.mxu0 %v1431_v2  ;;  %v415_v37 = vand.u32 4294901760, %v414_v12  ;;  %v431_v40 = vand.u32 4294901760, %v1585_v16  ;;  %v1690_v22 = vld [vmem:[%s1744_s2 + $0x8] sm:$0xff] }
  0x29   : > { %v1309_v32 = vpack.c.bf16 %v403_v15, %v391_v17  ;;  %v332_v38 = vand.u32 4294901760, %v331_v25  ;;  %704 = vmatmul.mubr.f32.gmra.mrb[2].mxu0 %v330_v13  ;;  %v1359_v42 = vpack.c.bf16 %v407_v4, %v395_v63  ;;  %v420_v44 = vsub.f32 %v1581_v11, %v419_v31 }
  0x2a   : > { %1308 = vmatpush1.bf16.msra.mxu1 %v1307_v20  ;;  %1356 = vmatpush1.bf16.msra.mxu0 %v1355_v14  ;;  %v1311_v41 = vpack.c.bf16 %v409_v29, %v397_v24  ;;  %v427_v43 = vand.u32 4294901760, %v426_v30  ;;  %v1361_v45 = vpack.c.bf16 %v425_v23, %v413_v9  ;;  %v432_v46 = vsub.f32 %v1585_v16, %v431_v40  ;;  %v1685_v20 = vld [vmem:[%s1744_s2] sm:$0xff] }
  0x2b   : > { %1310 = vmatprep.subr.bf16.mxu1 %v1309_v32  ;;  %1358 = vmatprep.subr.bf16.mxu0 %v1357_v21  ;;  %v421_v51 = vand.u32 4294901760, %v420_v44  ;;  %v1363_v13 = vpack.c.bf16 %v431_v40, %v419_v31  ;;  %v1317_v63 = vpack.c.bf16 %v1515_v28, %v1513_v27  ;;  %v1319_v0 = vpack.c.bf16 %v1529_v35, %v1527_v34 }
  0x2c   : > { %v1313_v50 = vpack.c.bf16 %v427_v43, %v415_v37  ;;  %333 = vmatmul.mubr.f32.gmra.mrb[2].mxu1 %v332_v38  ;;  %822 = vmatprep.mubr.f32.mxu0 %v1431_v2  ;;  %v433_v52 = vand.u32 4294901760, %v432_v46  ;;  %v1321_v3 = vpack.c.bf16 %v1542_v47, %v1537_v39  ;;  %v1323_v27 = vpack.c.bf16 %v1551_v53, %v1547_v49 }
  0x2d   : > { %483 = vmatprep.mubr.f32.mxu1 %v1431_v2  ;;  %v1325_v28 = vpack.c.bf16 %v1557_v56, %v1555_v55  ;;  %v1331_v34 = vpack.c.bf16 %v1585_v16, %v1581_v11  ;;  %v936_v9 = vlaneseq }
  0x2e   : > { %1312 = vmatpush1.bf16.msra.mxu1 %v1311_v41  ;;  %1360 = vmatpush1.bf16.msra.mxu0 %v1359_v42  ;;  %v1315_v62 = vpack.c.bf16 %v433_v52, %v421_v51 }
  0x2f   : > { %1314 = vmatprep.subr.bf16.mxu1 %v1313_v50  ;;  %1362 = vmatprep.subr.bf16.mxu0 %v1361_v45  ;;  %v1679_v18 = vand.u32 127, %v936_v9  ;;  %vm1150_vm10 = vcmp.lt.s32.totalorder %v936_v9, 256 }
  0x31   : > { %vm982_vm1 = vcmp.lt.s32.totalorder %v1679_v18, 15  ;;  %vm938_vm2 = vcmp.lt.s32.totalorder %v1679_v18, 17  ;;  %vm955_vm3 = vcmp.lt.s32.totalorder %v1679_v18, 16  ;;  %vm1009_vm4 = vcmp.lt.s32.totalorder %v1679_v18, 1 }
  0x32   : > { %1316 = vmatpush1.bf16.msra.mxu1 %v1315_v62  ;;  %1364 = vmatpush1.bf16.msra.mxu0 %v1363_v13  ;;  %vm1046_vm5 = vcmp.lt.s32.totalorder %v1679_v18, 127  ;;  %vm1073_vm6 = vcmp.lt.s32.totalorder %v1679_v18, 113  ;;  %vm1100_vm7 = vcmp.lt.s32.totalorder %v1679_v18, 112  ;;  %vm1123_vm8 = vcmp.lt.s32.totalorder %v1679_v18, 111 }
  0x33   : > { %1318 = vmatprep.subr.bf16.mxu1 %v1317_v63  ;;  %1366 = vmatprep.subr.bf16.mxu0 %v1511_v26  ;;  %v1327_v26 = vpack.c.bf16 %v1563_v59, %v1561_v58 }
  0x35   : > { %485 = vmatmul.mubr.f32.vlgmr.msra.gmra.mrb[0].mxu1 %v1484_v5  ;;  %824 = vmatmul.mubr.f32.vlgmr.msra.gmra.mrb[0].mxu0 %v1484_v5 }
  0x36   : > { %1320 = vmatpush1.bf16.msra.mxu1 %v1319_v0  ;;  %1368 = vmatpush1.bf16.msra.mxu0 %v1525_v33  ;;  %v1329_v33 = vpack.c.bf16 %v1574_v1, %v1569_v61 }
  0x37   : > { %1322 = vmatprep.subr.bf16.mxu1 %v1321_v3  ;;  %1370 = vmatprep.subr.bf16.mxu0 %v1531_v36 }
  0x38   : > { %490 = vmatprep.mubr.f32.mxu1 %v1431_v2  ;;  %829 = vmatprep.mubr.f32.mxu0 %v1431_v2 }
  0x39   : > { %492 = vmatmul.mubr.f32.gmra.mrb[2].mxu1 %v1486_v6  ;;  %831 = vmatmul.mubr.f32.gmra.mrb[2].mxu0 %v1486_v6 }
  0x3a   : > { %1324 = vmatpush1.bf16.msra.mxu1 %v1323_v27  ;;  %1372 = vmatpush1.bf16.msra.mxu0 %v1545_v48 }
  0x3b   : > { %1326 = vmatprep.subr.bf16.mxu1 %v1325_v28  ;;  %1374 = vmatprep.subr.bf16.mxu0 %v1553_v54 }
  0x3c   : > { %594 = vmatprep.mubr.f32.mxu1 %v1431_v2  ;;  %917 = vmatprep.mubr.f32.mxu0 %v1431_v2 }
  0x3e   : > { %1328 = vmatpush1.bf16.msra.mxu1 %v1327_v26  ;;  %1376 = vmatpush1.bf16.msra.mxu0 %v1559_v57 }
  0x3f   : > { %1330 = vmatprep.subr.bf16.mxu1 %v1329_v33  ;;  %1378 = vmatprep.subr.bf16.mxu0 %v1565_v60 }
  0x42   : > { %1332 = vmatpush1.bf16.msra.mxu1 %v1331_v34  ;;  %1380 = vmatpush1.bf16.msra.mxu0 %v1579_v10 }
  0x45   : > { %597 = vmatmul.mubr.f32.vlgmr.msra.gmra.mrb[0].mxu1 %v1490_v7  ;;  %919 = vmatmul.mubr.f32.vlgmr.msra.gmra.mrb[0].mxu0 %v1484_v5 }
  0x46   : > { %602 = vmatprep.mubr.f32.mxu1 %v1431_v2  ;;  %924 = vmatprep.mubr.f32.mxu0 %v1431_v2 }
  0x49   : > { %605 = vmatmul.mubr.f32.gmra.mrb[2].mxu1 %v1493_v8  ;;  %926 = vmatmul.mubr.f32.gmra.mrb[2].mxu0 %v1486_v6 }
 0x118   : > { %v598_v35 = vpop.f32.mrb[0].mxu1  ;;  %v920_v36 = vpop.f32.mrb[0].mxu0 }
 0x119   : > { %v1381_v39 = vadd.f32 %v920_v36, %v598_v35  ;;  %v600_v47 = vpop.f32.mrb[1].mxu1  ;;  %v922_v48 = vpop.f32.mrb[1].mxu0 }
 0x11a   : > { %v1669_v49 = vadd.f32 %v922_v48, %v600_v47 }
 0x11b   : > { %932 = vrot.lane.b32.xlu0 %v1381_v39, %s1432_s25  ;;  %v947_v55 = vrot.slane %v1381_v39, 1  ;;  %v974_v56 = vrot.slane %v1381_v39, 2  ;;  %v1001_v6 = vrot.slane %v1381_v39, 3  ;;  %v1038_v60 = vrot.slane %v1381_v39, 5 }
 0x11c   : > { %v927_v7 = vpop.f32.mrb[2].mxu0  ;;  %934 = vrot.lane.b32.xlu1 %v1669_v49, %s1432_s25  ;;  %v606_v5 = vpop.f32.mrb[2].mxu1  ;;  %v975_v57 = vrot.slane %v1669_v49, 2  ;;  %v948_v58 = vrot.slane %v1669_v49, 1  ;;  %v1002_v59 = vrot.slane %v1669_v49, 3  ;;  %v1039_v61 = vrot.slane %v1669_v49, 5 }
 0x11d   : > { %v1383_v53 = vadd.f32 %v927_v7, %v606_v5  ;;  %v608_v54 = vpop.f32.mrb[3].mxu1  ;;  %v929_v2 = vpop.f32.mrb[3].mxu0  ;;  %v1065_v1 = vrot.slane %v1381_v39, 6  ;;  %v1066_v10 = vrot.slane %v1669_v49, 6  ;;  %v1092_v11 = vrot.slane %v1381_v39, 7 }
 0x11e   : > { %v1384_v8 = vadd.f32 %v929_v2, %v608_v54  ;;  %v1093_v16 = vrot.slane %v1669_v49, 7  ;;  %v1696_v12 = vmul.f32 %v1381_v39, %v1685_v20  ;;  %v1029_v31 = vmul.f32 %v1669_v49, %v1690_v22 }
 0x11f   : > { %951 = vrot.lane.b32.xlu0 %v947_v55, %s1433_s26 }
 0x120   : > { %978 = vrot.lane.b32.xlu1 %v974_v56, %s1434_s27  ;;  %v1032_v51 = vrot.slane %v1696_v12, 4 }
 0x123   : > { %1005 = vrot.lane.b32.xlu0 %v1001_v6, %s1435_s28 }
 0x124   : > { %980 = vrot.lane.b32.xlu1 %v975_v57, %s1434_s27 }
 0x127   : > { %953 = vrot.lane.b32.xlu0 %v948_v58, %s1433_s26  ;;  %s206_s26 = scalar_lea.vmem %s1746_s4, %s1281_s21 }
 0x128   : > { %1007 = vrot.lane.b32.xlu1 %v1002_v59, %s1435_s28 }
 0x12b   : > { %1042 = vrot.lane.b32.xlu0 %v1038_v60, %s1436_s29 }
 0x12c   : > { %1044 = vrot.lane.b32.xlu1 %v1039_v61, %s1436_s29  ;;  %v1033_v61 = vrot.slane %v1029_v31, 4 }
 0x12f   : > { %1069 = vrot.lane.b32.xlu0 %v1065_v1, %s1437_s30 }
 0x130   : > { %1071 = vrot.lane.b32.xlu1 %v1066_v10, %s1437_s30 }
 0x133   : > { %1096 = vrot.lane.b32.xlu0 %v1092_v11, %s1438_s5 }
 0x134   : > { %1098 = vrot.lane.b32.xlu1 %v1093_v16, %s1438_s5 }
 0x137   : > { %1119 = vrot.lane.b32.xlu0 %v1383_v53, %s1439_s6 }
 0x138   : > { %1121 = vrot.lane.b32.xlu1 %v1384_v8, %s1439_s6 }
 0x18d   : > { %v933_v4 = vpop.permute.xlu0 %932 }
 0x18e   : > { %v935_v14 = vpop.permute.xlu1 %934 }
 0x18f   : > { %v939_v32 = vsel %vm938_vm2, %v933_v4, %v935_v14  ;;  %v940_v37 = vsel %vm938_vm2, %v935_v14, %v933_v4  ;;  %v1440_v14 = vmov 1966171168  }
 0x190   : > { %v941_v3 = vmul.f32 %v940_v37, %v1685_v20  ;;  %v942_v27 = vmul.f32 %v939_v32, %v1690_v22 }
 0x191   : > { %v952_v17 = vpop.permute.xlu0 %951 }
 0x192   : > { %v979_v19 = vpop.permute.xlu1 %978 }
 0x195   : > { %v1006_v21 = vpop.permute.xlu0 %1005 }
 0x196   : > { %v981_v23 = vpop.permute.xlu1 %980 }
 0x197   : > { %v983_v15 = vsel %vm982_vm1, %v979_v19, %v981_v23  ;;  %v984_v24 = vsel %vm982_vm1, %v981_v23, %v979_v19 }
 0x198   : > { %v987_v25 = vrot.slane %v984_v24, 6  ;;  %v988_v29 = vrot.slane %v983_v15, 6 }
 0x199   : > { %v954_v30 = vpop.permute.xlu0 %953 }
 0x19a   : > { %v956_v38 = vsel %vm955_vm3, %v952_v17, %v954_v30  ;;  %v957_v40 = vsel %vm955_vm3, %v954_v30, %v952_v17  ;;  %v1008_v41 = vpop.permute.xlu1 %1007  ;;  %v991_v52 = vmul.f32 %v987_v25, %v1685_v20  ;;  %v992_v13 = vmul.f32 %v988_v29, %v1690_v22 }
 0x19b   : > { %v960_v42 = vrot.slane %v957_v40, 7  ;;  %v961_v43 = vrot.slane %v956_v38, 7  ;;  %v1010_v44 = vsel %vm1009_vm4, %v1006_v21, %v1008_v41  ;;  %v1011_v45 = vsel %vm1009_vm4, %v1008_v41, %v1006_v21 }
 0x19c   : > { %v1014_v46 = vrot.slane %v1011_v45, 5  ;;  %v1015_v50 = vrot.slane %v1010_v44, 5  ;;  %v995_v49 = vrot.slane %v991_v52, 2  ;;  %v996_v7 = vrot.slane %v992_v13, 2  ;;  %v228_v52 = vld [vmem:[%s1744_s2 + $0x18] sm:$0xff] }
 0x19d   : > { %v964_v62 = vmul.f32 %v960_v42, %v1685_v20  ;;  %v965_v63 = vmul.f32 %v961_v43, %v1690_v22  ;;  %v1043_v0 = vpop.permute.xlu0 %1042  ;;  %v1134_v17 = vunpack.c.l.s4 %v1440_v14 }
 0x19e   : > { %v1018_v28 = vmul.f32 %v1014_v46, %v1685_v20  ;;  %v1019_v26 = vmul.f32 %v1015_v50, %v1690_v22  ;;  %v1045_v33 = vpop.permute.xlu1 %1044 }
 0x19f   : > { %v968_v34 = vrot.slane %v964_v62, 1  ;;  %v969_v35 = vrot.slane %v965_v63, 1  ;;  %v1047_v36 = vsel %vm1046_vm5, %v1043_v0, %v1045_v33  ;;  %v1048_v39 = vsel %vm1046_vm5, %v1045_v33, %v1043_v0 }
 0x1a0   : > { %v1051_v47 = vrot.slane %v1047_v36, 3  ;;  %v1052_v48 = vrot.slane %v1048_v39, 3  ;;  %v1022_v2 = vrot.slane %v1018_v28, 3  ;;  %v1023_v55 = vrot.slane %v1019_v26, 3 }
 0x1a1   : > { %v972_v5 = vadd.f32 %v968_v34, %v941_v3  ;;  %v973_v53 = vadd.f32 %v969_v35, %v942_v27  ;;  %v1070_v54 = vpop.permute.xlu0 %1069  ;;  %v1135_v63 = vunpack.c.0.s8 %v1134_v17  ;;  %v1137_v0 = vshrl.u32 %v936_v9, 7 }
 0x1a2   : > { %v1055_v8 = vmul.f32 %v1051_v47, %v1685_v20  ;;  %v1056_v56 = vmul.f32 %v1052_v48, %v1690_v22  ;;  %v1072_v6 = vpop.permute.xlu1 %1071 }
 0x1a3   : > { %v999_v57 = vadd.f32 %v995_v49, %v972_v5  ;;  %v1000_v58 = vadd.f32 %v996_v7, %v973_v53  ;;  %v1074_v59 = vsel %vm1073_vm6, %v1070_v54, %v1072_v6  ;;  %v1075_v60 = vsel %vm1073_vm6, %v1072_v6, %v1070_v54 }
 0x1a4   : > { %v1078_v1 = vrot.slane %v1074_v59, 2  ;;  %v1079_v10 = vrot.slane %v1075_v60, 2  ;;  %v1059_v19 = vrot.slane %v1055_v8, 5  ;;  %v1060_v21 = vrot.slane %v1056_v56, 5 }
 0x1a5   : > { %v1026_v11 = vadd.f32 %v1022_v2, %v999_v57  ;;  %v1027_v16 = vadd.f32 %v1023_v55, %v1000_v58  ;;  %v1097_v4 = vpop.permute.xlu0 %1096  ;;  %v1138_v35 = vsub.s32 %v1135_v63, %v1137_v0  ;;  %vm1183_vm11 = vcmp.eq.s32.totalorder %v1137_v0, 1 }
 0x1a6   : > { %v1082_v23 = vmul.f32 %v1078_v1, %v1685_v20  ;;  %v1083_v15 = vmul.f32 %v1079_v10, %v1690_v22  ;;  %v1099_v24 = vpop.permute.xlu1 %1098  ;;  %vm1182_vm12 = vcmp.eq.s32.totalorder %v1137_v0, 0 }
 0x1a7   : > { %v1036_v12 = vadd.f32 %v1032_v51, %v1026_v11  ;;  %v1037_v25 = vadd.f32 %v1033_v61, %v1027_v16  ;;  %v1101_v29 = vsel %vm1100_vm7, %v1097_v4, %v1099_v24  ;;  %v1102_v30 = vsel %vm1100_vm7, %v1099_v24, %v1097_v4  ;;  %v227_v51 = vld [vmem:[%s1744_s2 + $0x10] sm:$0xff] }
 0x1a8   : > { %v1086_v31 = vrot.slane %v1082_v23, 6  ;;  %v1087_v32 = vrot.slane %v1083_v15, 6  ;;  %v1105_v37 = vrot.slane %v1101_v29, 1  ;;  %v1106_v38 = vrot.slane %v1102_v30, 1 }
 0x1a9   : > { %v1063_v40 = vadd.f32 %v1059_v19, %v1036_v12  ;;  %v1064_v41 = vadd.f32 %v1060_v21, %v1037_v25  ;;  %v1120_v42 = vpop.permute.xlu0 %1119 }
 0x1aa   : > { %v1109_v43 = vmul.f32 %v1105_v37, %v1685_v20  ;;  %v1110_v44 = vmul.f32 %v1106_v38, %v1690_v22  ;;  %v1122_v45 = vpop.permute.xlu1 %1121 }
 0x1ab   : > { %v1090_v46 = vadd.f32 %v1086_v31, %v1063_v40  ;;  %v1091_v50 = vadd.f32 %v1087_v32, %v1064_v41  ;;  %v1124_v13 = vsel %vm1123_vm8, %v1120_v42, %v1122_v45  ;;  %v1125_v62 = vsel %vm1123_vm8, %v1122_v45, %v1120_v42 }
 0x1ac   : > { %v1113_v20 = vrot.slane %v1109_v43, 7  ;;  %v1114_v22 = vrot.slane %v1110_v44, 7  ;;  %v1126_v28 = vmul.f32 %v1124_v13, %v227_v51  ;;  %v1127_v26 = vmul.f32 %v1125_v62, %v228_v52 }
 0x1ae   : > { %v1117_v3 = vadd.f32 %v1113_v20, %v1090_v46  ;;  %v1118_v27 = vadd.f32 %v1114_v22, %v1091_v50 }
 0x1b0   : > { %v1128_v33 = vadd.f32 %v1126_v28, %v1117_v3  ;;  %v1129_v34 = vadd.f32 %v1127_v26, %v1118_v27 }
 0x1b2   : > { %v1132_v36 = vcombine.low %v1128_v33, %v1129_v34  ;;  %v1154_v39 = vsel %vm1153_vm9, %v1128_v33, 0.0  ;;  %v1155_v47 = vsel %vm1153_vm9, %v1129_v34, 0.0  ;;  %v1166_v48 = vmul.f32 %v1128_v33, %v1128_v33 }
 0x1b3   : > { %v1156_v18 = vadd.f32 %v1155_v47, %v1154_v39  ;;  %v1167_v49 = vmul.f32 %v1129_v34, %v1129_v34 }
 0x1b4   : > { %v1168_v7 = vsel %vm1153_vm9, %v1166_v48, 0.0  ;;  %v1139_v5 = vrot.slane %v1132_v36, %v1138_v35 }
 0x1b5   : > { %1157 = vadd.xlane.f32.xlu0 %v1156_v18  ;;  %v1169_v53 = vsel %vm1153_vm9, %v1167_v49, 0.0 }
 0x1b6   : > { %v1170_v54 = vadd.f32 %v1169_v53, %v1168_v7  ;;  %v1146_v2 = vrot.slane %v1139_v5, %v1138_v35 }
 0x1b8   : > { %1171 = vadd.xlane.f32.xlu1 %v1170_v54  ;;  %1152 = vst.msk [vmem:[%s202_s20] sm:$0x3] %vm1150_vm10, %v1146_v2 }
 0x242   : > { %v1158_v55 = vpop.xlane.xlu0 %1157 }
 0x243   : > { %v1159_v8 = vrot.slane %v1158_v55, 4 }
 0x245   : > { %v1160_v56 = vadd.f32 %v1159_v8, %v1158_v55  ;;  %v1172_v6 = vpop.xlane.xlu1 %1171 }
 0x246   : > { %v1173_v57 = vrot.slane %v1172_v6, 4 }
 0x247   : > { %v1161_v58 = vrot.slane %v1160_v56, 2 }
 0x248   : > { %v1174_v59 = vadd.f32 %v1173_v57, %v1172_v6 }
 0x249   : > { %v1162_v60 = vadd.f32 %v1161_v58, %v1160_v56 }
 0x24a   : > { %v1175_v61 = vrot.slane %v1174_v59, 2 }
 0x24b   : > { %v1163_v1 = vrot.slane %v1162_v60, 1 }
 0x24c   : > { %v1176_v10 = vadd.f32 %v1175_v61, %v1174_v59 }
 0x24d   : > { %v1164_v11 = vadd.f32 %v1163_v1, %v1162_v60 }
 0x24e   : > { %v1177_v16 = vrot.slane %v1176_v10, 1 }
 0x24f   : > { %1401 = vpush %v1164_v11 }
 0x250   : > { %v1178_v9 = vadd.f32 %v1177_v16, %v1176_v10 }
 0x252   : > { %1403 = vpush %v1178_v9 }
 0x280   : > { %s1402_s22 = spop %1401 }
 0x281   : > { %v1186_v14 = vstv %s1402_s22 }
 0x283   : > { %s1404_s23 = spop %1403 }
 0x284   : > { %v1184_v4 = vstv %s1404_s23 }
 0x285   : > { %v1185_v17 = vsel %vm1183_vm11, %v1184_v4, 0.0 }
 0x286   : > { %v1187_v19 = vsel %vm1182_vm12, %v1186_v14, %v1185_v17 }
 0x287   : > { %1188 = vst [vmem:[%s206_s26] sm:$0xff] %v1187_v19 }
 0x288 PF: > { %s15_s15 = sadd.s32 1, %s1429_s15  }
 0x289   : > { %p12_p4 = scmp.ge.s32.totalorder %s15_s15, 4  }
 0x28b   :  { %14 = sbr.rel (!%p12_p4) target bundleno = 1 (0x1), region = 74 }

</bundles_post_ra>
